<compile_context>
chip_gen: v7x
topology: tpu7x:2x2x1
jax: 0.10.0
libtpu: 0.0.40
codegen_flags: <defaults>
</compile_context>

<pallas_src>
import functools

import jax
import jax.numpy as jnp
from jax import lax
from jax.experimental import pallas as pl
from jax.experimental.pallas import tpu as pltpu


# ----------------------------- fused kernel --------------------------------

def _ln(x, g, b, eps=1e-12):
    mu = jnp.mean(x, axis=-1, keepdims=True)
    var = jnp.mean(jnp.square(x - mu), axis=-1, keepdims=True)
    return (x - mu) * lax.rsqrt(var + eps) * g + b


def _gelu_tanh(x):
    # tanh-approx GELU: tanh runs on the (otherwise idle) EUP slot instead of a
    # long VPU erf polynomial.  Small deviation from PyTorch's exact-erf default.
    return 0.5 * x * (1.0 + jnp.tanh(0.7978845608028654 * (x + 0.044715 * x * x * x)))


def _fused_bert_kernel(vl_ref,                      # scalar prefetch: [B] int32 (SMEM)
                       x_ref,                       # [1, S, H] embeddings for this batch
                       emb_g_ref, emb_b_ref,
                       wqkv_ref, bqkv_ref,          # Q columns pre-scaled by 1/sqrt(dh)
                       wo_ref, bo_ref,
                       ln1_g_ref, ln1_b_ref,
                       w1_ref, b1_ref, w2_ref, b2_ref,
                       ln2_g_ref, ln2_b_ref,
                       pool_w_ref, pool_b_ref,
                       cls_w_ref, cls_b_ref,        # padded to 128 lanes
                       o_ref,                       # [1, 1, 128]
                       *, heads, dh):
    f32 = jnp.float32
    hidden = heads * dh
    S = x_ref.shape[1]
    b = pl.program_id(0)

    # key-valid additive mask built in-kernel from valid_length (no HBM mask DMA)
    vl = vl_ref[b]
    key_pos = lax.broadcasted_iota(jnp.int32, (1, S), 1)
    add_mask = jnp.where(key_pos < vl, 0.0, -10000.0).astype(f32)        # [1, S]

    # embedding layernorm
    x = _ln(x_ref[0].astype(f32), emb_g_ref[...], emb_b_ref[...])        # [S, H]

    # fused QKV projection: one MXU matmul, N = 3*hidden lanes
    qkv = jnp.dot(x, wqkv_ref[...], preferred_element_type=f32) + bqkv_ref[...]

    # multi-head attention; heads unrolled at trace time, per-batch [S, S] scores
    ctx_heads = []
    for h in range(heads):
        lo = h * dh
        q_h = qkv[:, lo:lo + dh]                                         # [S, dh]
        k_h = qkv[:, hidden + lo:hidden + lo + dh]
        v_h = qkv[:, 2 * hidden + lo:2 * hidden + lo + dh]
        # contract last dims of both operands: no explicit k.T / XLU transpose
        s = lax.dot_general(q_h, k_h, (((1,), (1,)), ((), ())),
                            preferred_element_type=f32) + add_mask       # [S, S]
        s = s - jnp.max(s, axis=-1, keepdims=True)
        p = jnp.exp(s)
        p = p * pl.reciprocal(jnp.sum(p, axis=-1, keepdims=True), approx=True)
        ctx_heads.append(jnp.dot(p, v_h, preferred_element_type=f32))    # [S, dh]

    # single K=hidden output-projection matmul (not heads x K=dh pushes)
    ctx = jnp.concatenate(ctx_heads, axis=-1)                            # [S, H]
    attn_out = jnp.dot(ctx, wo_ref[...], preferred_element_type=f32) + bo_ref[...]

    # residual + LN1
    x1 = _ln(x + attn_out, ln1_g_ref[...], ln1_b_ref[...])

    # feed-forward (gelu) + residual + LN2
    h1 = _gelu_tanh(jnp.dot(x1, w1_ref[...], preferred_element_type=f32) + b1_ref[...])
    h2 = jnp.dot(h1, w2_ref[...], preferred_element_type=f32) + b2_ref[...]
    x2 = _ln(x1 + h2, ln2_g_ref[...], ln2_b_ref[...])

    # pooler (dense + tanh) + classifier on the CLS row only (row 0, always valid)
    cls_row = x2[0:1, :]                                                 # [1, H]
    pooled = jnp.tanh(jnp.dot(cls_row, pool_w_ref[...], preferred_element_type=f32)
                      + pool_b_ref[...])
    logits = jnp.dot(pooled, cls_w_ref[...], preferred_element_type=f32) + cls_b_ref[...]
    o_ref[0] = logits.astype(o_ref.dtype)                                # [1, 128]


# --------------------------- parameter init & prep --------------------------

def init_params(key, vocab=50, hidden=32, inter=64, max_pos=16,
                type_vocab=2, num_classes=74):
    def nrm(k, shape, scale=0.02):
        return (scale * jax.random.normal(k, shape)).astype(jnp.float32)

    ks = jax.random.split(key, 16)
    f32 = jnp.float32
    return {
        "word_emb": nrm(ks[0], (vocab, hidden)),
        "pos_emb": nrm(ks[1], (max_pos, hidden)),
        "type_emb": nrm(ks[2], (type_vocab, hidden)),
        "emb_ln_g": jnp.ones((hidden,), f32), "emb_ln_b": jnp.zeros((hidden,), f32),
        "wq": nrm(ks[3], (hidden, hidden)), "bq": jnp.zeros((hidden,), f32),
        "wk": nrm(ks[4], (hidden, hidden)), "bk": jnp.zeros((hidden,), f32),
        "wv": nrm(ks[5], (hidden, hidden)), "bv": jnp.zeros((hidden,), f32),
        "wo": nrm(ks[6], (hidden, hidden)), "bo": jnp.zeros((hidden,), f32),
        "ln1_g": jnp.ones((hidden,), f32), "ln1_b": jnp.zeros((hidden,), f32),
        "w1": nrm(ks[7], (hidden, inter)), "b1": jnp.zeros((inter,), f32),
        "w2": nrm(ks[8], (inter, hidden)), "b2": jnp.zeros((hidden,), f32),
        "ln2_g": jnp.ones((hidden,), f32), "ln2_b": jnp.zeros((hidden,), f32),
        "pool_w": nrm(ks[9], (hidden, hidden)), "pool_b": jnp.zeros((hidden,), f32),
        "cls_w": nrm(ks[10], (hidden, num_classes)),
        "cls_b": jnp.zeros((num_classes,), f32),
    }


def prepare_kernel_params(params, heads):
    """One-time weight transform (hoisted out of the per-call hot path)."""
    hidden = params["word_emb"].shape[1]
    dh = hidden // heads
    scale = 1.0 / float(dh) ** 0.5
    num_classes = params["cls_b"].shape[0]
    ncp = ((num_classes + 127) // 128) * 128

    def r2(v):
        return v.reshape(1, -1)

    # 1/sqrt(dh) folded into Q columns; classifier zero-padded to 128 lanes
    wqkv = jnp.concatenate([params["wq"] * scale, params["wk"], params["wv"]], axis=1)
    bqkv = jnp.concatenate([params["bq"] * scale, params["bk"], params["bv"]], axis=0)
    cls_w = jnp.zeros((hidden, ncp), jnp.float32).at[:, :num_classes].set(params["cls_w"])
    cls_b = jnp.zeros((ncp,), jnp.float32).at[:num_classes].set(params["cls_b"])

    return {
        "word_emb": params["word_emb"], "pos_emb": params["pos_emb"],
        "type_emb": params["type_emb"],
        "emb_ln_g": r2(params["emb_ln_g"]), "emb_ln_b": r2(params["emb_ln_b"]),
        "wqkv": wqkv, "bqkv": r2(bqkv),
        "wo": params["wo"], "bo": r2(params["bo"]),
        "ln1_g": r2(params["ln1_g"]), "ln1_b": r2(params["ln1_b"]),
        "w1": params["w1"], "b1": r2(params["b1"]),
        "w2": params["w2"], "b2": r2(params["b2"]),
        "ln2_g": r2(params["ln2_g"]), "ln2_b": r2(params["ln2_b"]),
        "pool_w": params["pool_w"], "pool_b": r2(params["pool_b"]),
        "cls_w": cls_w, "cls_b": r2(cls_b),
    }


# ------------------------------ forward pass --------------------------------

@functools.partial(jax.jit, static_argnames=("heads", "num_classes"))
def bert_classifier_forward(prep, token_ids, valid_length, segment_ids,
                            *, heads, num_classes):
    B, S = token_ids.shape
    hidden = prep["word_emb"].shape[1]
    dh = hidden // heads
    ncp = prep["cls_w"].shape[1]

    # embeddings: table gathers left to XLA (tiny at these shapes)
    # TODO(synk): at real S/hidden, fuse the gather via PrefetchScalarGridSpec + pl.Element.
    x = (prep["word_emb"][token_ids]
         + prep["pos_emb"][:S][None, :, :]
         + prep["type_emb"][segment_ids]).astype(jnp.float32)            # [B, S, H]

    kern = functools.partial(_fused_bert_kernel, heads=heads, dh=dh)

    def wmap(b, vl):                         # weights: same block every grid step
        return (0, 0)

    weight_names = ["emb_ln_g", "emb_ln_b", "wqkv", "bqkv", "wo", "bo",
                    "ln1_g", "ln1_b", "w1", "b1", "w2", "b2",
                    "ln2_g", "ln2_b", "pool_w", "pool_b", "cls_w", "cls_b"]
    weight_specs = [pl.BlockSpec(prep[n].shape, wmap) for n in weight_names]

    grid_spec = pltpu.PrefetchScalarGridSpec(
        num_scalar_prefetch=1,               # valid_length -> SMEM
        grid=(B,),
        in_specs=[pl.BlockSpec((1, S, hidden), lambda b, vl: (b, 0, 0))] + weight_specs,
        out_specs=pl.BlockSpec((1, 1, ncp), lambda b, vl: (b, 0, 0)),
    )

    out = pl.pallas_call(
        kern,
        out_shape=jax.ShapeDtypeStruct((B, 1, ncp), jnp.float32),
        grid_spec=grid_spec,
        compiler_params=pltpu.CompilerParams(
            dimension_semantics=("parallel",)),   # batch axis -> v7x megacore
    )(valid_length.astype(jnp.int32), x, *[prep[n] for n in weight_names])

    # TODO(synk): training-mode dropout (dr_rate) not implemented; eval identity.
    return out[:, 0, :num_classes]


# ---------------------------------- main ------------------------------------

if __name__ == "__main__":
    B, S, HIDDEN, HEADS, NUM_CLASSES, VOCAB = 2, 8, 32, 4, 74, 50

    key = jax.random.PRNGKey(0)
    kp, kt, ks = jax.random.split(key, 3)

    params = init_params(kp, vocab=VOCAB, hidden=HIDDEN, inter=2 * HIDDEN,
                         max_pos=S, type_vocab=2, num_classes=NUM_CLASSES)
    prep = prepare_kernel_params(params, heads=HEADS)      # one-time weight prep

    token_ids = jax.random.randint(kt, (B, S), 0, VOCAB, dtype=jnp.int32)
    segment_ids = jnp.zeros((B, S), dtype=jnp.int32)
    valid_length = jnp.array([5, 8], dtype=jnp.int32)

    logits = bert_classifier_forward(prep, token_ids, valid_length, segment_ids,
                                     heads=HEADS, num_classes=NUM_CLASSES)
    jax.block_until_ready(logits)
    assert logits.shape == (B, NUM_CLASSES) and logits.dtype == jnp.float32
    assert bool(jnp.all(jnp.isfinite(logits)))
    print("KERNEL_OK")
</pallas_src>

<mosaic_0001>
module attributes {stable_mosaic.version = 11 : i64} {
  func.func @_fused_bert_kernel(%arg0: i32, %arg1: memref<2xi32, #tpu.memory_space<smem>>, %arg2: memref<1x8x32xf32, #tpu.memory_space<vmem>>, %arg3: memref<1x32xf32, #tpu.memory_space<vmem>>, %arg4: memref<1x32xf32, #tpu.memory_space<vmem>>, %arg5: memref<32x96xf32, #tpu.memory_space<vmem>>, %arg6: memref<1x96xf32, #tpu.memory_space<vmem>>, %arg7: memref<32x32xf32, #tpu.memory_space<vmem>>, %arg8: memref<1x32xf32, #tpu.memory_space<vmem>>, %arg9: memref<1x32xf32, #tpu.memory_space<vmem>>, %arg10: memref<1x32xf32, #tpu.memory_space<vmem>>, %arg11: memref<32x64xf32, #tpu.memory_space<vmem>>, %arg12: memref<1x64xf32, #tpu.memory_space<vmem>>, %arg13: memref<64x32xf32, #tpu.memory_space<vmem>>, %arg14: memref<1x32xf32, #tpu.memory_space<vmem>>, %arg15: memref<1x32xf32, #tpu.memory_space<vmem>>, %arg16: memref<1x32xf32, #tpu.memory_space<vmem>>, %arg17: memref<32x32xf32, #tpu.memory_space<vmem>>, %arg18: memref<1x32xf32, #tpu.memory_space<vmem>>, %arg19: memref<32x128xf32, #tpu.memory_space<vmem>>, %arg20: memref<1x128xf32, #tpu.memory_space<vmem>>, %arg21: memref<1x1x128xf32, #tpu.memory_space<vmem>>) attributes {dimension_semantics = [#tpu.dimension_semantics<parallel>], iteration_bounds = array<i64: 2>, scalar_prefetch = 1 : i64, scratch_operands = 0 : i64, tpu.core_type = #tpu.core_type<tc>, window_params = [{transform_indices = @transform_0, window_bounds = array<i64: 1, 8, 32>}, {pipeline_mode = #tpu.pipeline_mode<synchronous>, transform_indices = @transform_1, window_bounds = array<i64: 1, 32>}, {pipeline_mode = #tpu.pipeline_mode<synchronous>, transform_indices = @transform_2, window_bounds = array<i64: 1, 32>}, {pipeline_mode = #tpu.pipeline_mode<synchronous>, transform_indices = @transform_3, window_bounds = array<i64: 32, 96>}, {pipeline_mode = #tpu.pipeline_mode<synchronous>, transform_indices = @transform_4, window_bounds = array<i64: 1, 96>}, {pipeline_mode = #tpu.pipeline_mode<synchronous>, transform_indices = @transform_5, window_bounds = array<i64: 32, 32>}, {pipeline_mode = #tpu.pipeline_mode<synchronous>, transform_indices = @transform_6, window_bounds = array<i64: 1, 32>}, {pipeline_mode = #tpu.pipeline_mode<synchronous>, transform_indices = @transform_7, window_bounds = array<i64: 1, 32>}, {pipeline_mode = #tpu.pipeline_mode<synchronous>, transform_indices = @transform_8, window_bounds = array<i64: 1, 32>}, {pipeline_mode = #tpu.pipeline_mode<synchronous>, transform_indices = @transform_9, window_bounds = array<i64: 32, 64>}, {pipeline_mode = #tpu.pipeline_mode<synchronous>, transform_indices = @transform_10, window_bounds = array<i64: 1, 64>}, {pipeline_mode = #tpu.pipeline_mode<synchronous>, transform_indices = @transform_11, window_bounds = array<i64: 64, 32>}, {pipeline_mode = #tpu.pipeline_mode<synchronous>, transform_indices = @transform_12, window_bounds = array<i64: 1, 32>}, {pipeline_mode = #tpu.pipeline_mode<synchronous>, transform_indices = @transform_13, window_bounds = array<i64: 1, 32>}, {pipeline_mode = #tpu.pipeline_mode<synchronous>, transform_indices = @transform_14, window_bounds = array<i64: 1, 32>}, {pipeline_mode = #tpu.pipeline_mode<synchronous>, transform_indices = @transform_15, window_bounds = array<i64: 32, 32>}, {pipeline_mode = #tpu.pipeline_mode<synchronous>, transform_indices = @transform_16, window_bounds = array<i64: 1, 32>}, {pipeline_mode = #tpu.pipeline_mode<synchronous>, transform_indices = @transform_17, window_bounds = array<i64: 32, 128>}, {pipeline_mode = #tpu.pipeline_mode<synchronous>, transform_indices = @transform_18, window_bounds = array<i64: 1, 128>}, {transform_indices = @transform_19, window_bounds = array<i64: 1, 1, 128>}]} {
    %0 = arith.index_cast %arg0 : i32 to index
    %1 = memref.load %arg1[%0] : memref<2xi32, #tpu.memory_space<smem>>
    %2 = tpu.iota {dimensions = array<i32: 1>} : vector<1x8xi32>
    %3 = vector.broadcast %1 : i32 to vector<1x8xi32>
    %4 = arith.cmpi slt, %2, %3 : vector<1x8xi32>
    %cst = arith.constant 0.000000e+00 : f32
    %cst_0 = arith.constant -1.000000e+04 : f32
    %5 = vector.broadcast %cst : f32 to vector<1x8xf32>
    %6 = vector.broadcast %cst_0 : f32 to vector<1x8xf32>
    %7 = arith.select %4, %5, %6 : vector<1x8xi1>, vector<1x8xf32>
    %c0 = arith.constant 0 : index
    %c0_1 = arith.constant 0 : index
    %c0_2 = arith.constant 0 : index
    %8 = vector.load %arg2[%c0, %c0_1, %c0_2] : memref<1x8x32xf32, #tpu.memory_space<vmem>>, vector<1x8x32xf32>
    %9 = vector.shape_cast %8 : vector<1x8x32xf32> to vector<8x32xf32>
    %c0_3 = arith.constant 0 : index
    %c0_4 = arith.constant 0 : index
    %10 = vector.load %arg3[%c0_3, %c0_4] : memref<1x32xf32, #tpu.memory_space<vmem>>, vector<1x32xf32>
    %c0_5 = arith.constant 0 : index
    %c0_6 = arith.constant 0 : index
    %11 = vector.load %arg4[%c0_5, %c0_6] : memref<1x32xf32, #tpu.memory_space<vmem>>, vector<1x32xf32>
    %cst_7 = arith.constant dense<0.000000e+00> : vector<8xf32>
    %12 = vector.multi_reduction <add>, %9, %cst_7 [1] : vector<8x32xf32> to vector<8xf32>
    %13 = vector.shape_cast %12 : vector<8xf32> to vector<8x1xf32>
    %cst_8 = arith.constant 3.200000e+01 : f32
    %14 = vector.broadcast %cst_8 : f32 to vector<8x1xf32>
    %15 = arith.divf %13, %14 : vector<8x1xf32>
    %16 = vector.broadcast %15 : vector<8x1xf32> to vector<8x32xf32>
    %17 = arith.subf %9, %16 : vector<8x32xf32>
    %18 = arith.mulf %17, %17 : vector<8x32xf32>
    %cst_9 = arith.constant dense<0.000000e+00> : vector<8xf32>
    %19 = vector.multi_reduction <add>, %18, %cst_9 [1] : vector<8x32xf32> to vector<8xf32>
    %20 = vector.shape_cast %19 : vector<8xf32> to vector<8x1xf32>
    %cst_10 = arith.constant 3.200000e+01 : f32
    %21 = vector.broadcast %cst_10 : f32 to vector<8x1xf32>
    %22 = arith.divf %20, %21 : vector<8x1xf32>
    %23 = vector.broadcast %15 : vector<8x1xf32> to vector<8x32xf32>
    %24 = arith.subf %9, %23 : vector<8x32xf32>
    %cst_11 = arith.constant 9.99999996E-13 : f32
    %25 = vector.broadcast %cst_11 : f32 to vector<8x1xf32>
    %26 = arith.addf %22, %25 : vector<8x1xf32>
    %27 = math.rsqrt %26 : vector<8x1xf32>
    %28 = vector.broadcast %27 : vector<8x1xf32> to vector<8x32xf32>
    %29 = arith.mulf %24, %28 : vector<8x32xf32>
    %30 = vector.broadcast %10 : vector<1x32xf32> to vector<8x32xf32>
    %31 = arith.mulf %29, %30 : vector<8x32xf32>
    %32 = vector.broadcast %11 : vector<1x32xf32> to vector<8x32xf32>
    %33 = arith.addf %31, %32 : vector<8x32xf32>
    %c0_12 = arith.constant 0 : index
    %c0_13 = arith.constant 0 : index
    %34 = vector.load %arg5[%c0_12, %c0_13] : memref<32x96xf32, #tpu.memory_space<vmem>>, vector<32x96xf32>
    %cst_14 = arith.constant dense<0.000000e+00> : vector<8x96xf32>
    %35 = tpu.matmul %33, %34, %cst_14 {dimension_numbers = #tpu.dot_dimension_numbers<[1], [0], [0], [1], [0, 0, 1, 1], [], []>} : vector<8x32xf32>, vector<32x96xf32>, vector<8x96xf32> -> vector<8x96xf32>
    %c0_15 = arith.constant 0 : index
    %c0_16 = arith.constant 0 : index
    %36 = vector.load %arg6[%c0_15, %c0_16] : memref<1x96xf32, #tpu.memory_space<vmem>>, vector<1x96xf32>
    %37 = vector.broadcast %36 : vector<1x96xf32> to vector<8x96xf32>
    %38 = arith.addf %35, %37 : vector<8x96xf32>
    %39 = vector.extract_strided_slice %38 {offsets = [0, 0], sizes = [8, 8], strides = [1, 1]} : vector<8x96xf32> to vector<8x8xf32>
    %40 = vector.extract_strided_slice %38 {offsets = [0, 32], sizes = [8, 8], strides = [1, 1]} : vector<8x96xf32> to vector<8x8xf32>
    %41 = vector.extract_strided_slice %38 {offsets = [0, 64], sizes = [8, 8], strides = [1, 1]} : vector<8x96xf32> to vector<8x8xf32>
    %cst_17 = arith.constant dense<0.000000e+00> : vector<8x8xf32>
    %42 = tpu.matmul %39, %40, %cst_17 {dimension_numbers = #tpu.dot_dimension_numbers<[1], [1], [0], [0], [0, 0, 1, 0], [], []>} : vector<8x8xf32>, vector<8x8xf32>, vector<8x8xf32> -> vector<8x8xf32>
    %43 = vector.broadcast %7 : vector<1x8xf32> to vector<8x8xf32>
    %44 = arith.addf %42, %43 : vector<8x8xf32>
    %cst_18 = arith.constant dense<0xFF800000> : vector<8xf32>
    %45 = vector.multi_reduction <maximumf>, %44, %cst_18 [1] : vector<8x8xf32> to vector<8xf32>
    %46 = vector.shape_cast %45 : vector<8xf32> to vector<8x1xf32>
    %47 = vector.broadcast %46 : vector<8x1xf32> to vector<8x8xf32>
    %48 = arith.subf %44, %47 : vector<8x8xf32>
    %49 = math.exp %48 : vector<8x8xf32>
    %cst_19 = arith.constant dense<0.000000e+00> : vector<8xf32>
    %50 = vector.multi_reduction <add>, %49, %cst_19 [1] : vector<8x8xf32> to vector<8xf32>
    %51 = vector.shape_cast %50 : vector<8xf32> to vector<8x1xf32>
    %52 = tpu.reciprocal %51 {approx = true} : vector<8x1xf32> -> vector<8x1xf32>
    %53 = vector.broadcast %52 : vector<8x1xf32> to vector<8x8xf32>
    %54 = arith.mulf %49, %53 : vector<8x8xf32>
    %cst_20 = arith.constant dense<0.000000e+00> : vector<8x8xf32>
    %55 = tpu.matmul %54, %41, %cst_20 {dimension_numbers = #tpu.dot_dimension_numbers<[1], [0], [0], [1], [0, 0, 1, 1], [], []>} : vector<8x8xf32>, vector<8x8xf32>, vector<8x8xf32> -> vector<8x8xf32>
    %56 = vector.extract_strided_slice %38 {offsets = [0, 8], sizes = [8, 8], strides = [1, 1]} : vector<8x96xf32> to vector<8x8xf32>
    %57 = vector.extract_strided_slice %38 {offsets = [0, 40], sizes = [8, 8], strides = [1, 1]} : vector<8x96xf32> to vector<8x8xf32>
    %58 = vector.extract_strided_slice %38 {offsets = [0, 72], sizes = [8, 8], strides = [1, 1]} : vector<8x96xf32> to vector<8x8xf32>
    %cst_21 = arith.constant dense<0.000000e+00> : vector<8x8xf32>
    %59 = tpu.matmul %56, %57, %cst_21 {dimension_numbers = #tpu.dot_dimension_numbers<[1], [1], [0], [0], [0, 0, 1, 0], [], []>} : vector<8x8xf32>, vector<8x8xf32>, vector<8x8xf32> -> vector<8x8xf32>
    %60 = vector.broadcast %7 : vector<1x8xf32> to vector<8x8xf32>
    %61 = arith.addf %59, %60 : vector<8x8xf32>
    %cst_22 = arith.constant dense<0xFF800000> : vector<8xf32>
    %62 = vector.multi_reduction <maximumf>, %61, %cst_22 [1] : vector<8x8xf32> to vector<8xf32>
    %63 = vector.shape_cast %62 : vector<8xf32> to vector<8x1xf32>
    %64 = vector.broadcast %63 : vector<8x1xf32> to vector<8x8xf32>
    %65 = arith.subf %61, %64 : vector<8x8xf32>
    %66 = math.exp %65 : vector<8x8xf32>
    %cst_23 = arith.constant dense<0.000000e+00> : vector<8xf32>
    %67 = vector.multi_reduction <add>, %66, %cst_23 [1] : vector<8x8xf32> to vector<8xf32>
    %68 = vector.shape_cast %67 : vector<8xf32> to vector<8x1xf32>
    %69 = tpu.reciprocal %68 {approx = true} : vector<8x1xf32> -> vector<8x1xf32>
    %70 = vector.broadcast %69 : vector<8x1xf32> to vector<8x8xf32>
    %71 = arith.mulf %66, %70 : vector<8x8xf32>
    %cst_24 = arith.constant dense<0.000000e+00> : vector<8x8xf32>
    %72 = tpu.matmul %71, %58, %cst_24 {dimension_numbers = #tpu.dot_dimension_numbers<[1], [0], [0], [1], [0, 0, 1, 1], [], []>} : vector<8x8xf32>, vector<8x8xf32>, vector<8x8xf32> -> vector<8x8xf32>
    %73 = vector.extract_strided_slice %38 {offsets = [0, 16], sizes = [8, 8], strides = [1, 1]} : vector<8x96xf32> to vector<8x8xf32>
    %74 = vector.extract_strided_slice %38 {offsets = [0, 48], sizes = [8, 8], strides = [1, 1]} : vector<8x96xf32> to vector<8x8xf32>
    %75 = vector.extract_strided_slice %38 {offsets = [0, 80], sizes = [8, 8], strides = [1, 1]} : vector<8x96xf32> to vector<8x8xf32>
    %cst_25 = arith.constant dense<0.000000e+00> : vector<8x8xf32>
    %76 = tpu.matmul %73, %74, %cst_25 {dimension_numbers = #tpu.dot_dimension_numbers<[1], [1], [0], [0], [0, 0, 1, 0], [], []>} : vector<8x8xf32>, vector<8x8xf32>, vector<8x8xf32> -> vector<8x8xf32>
    %77 = vector.broadcast %7 : vector<1x8xf32> to vector<8x8xf32>
    %78 = arith.addf %76, %77 : vector<8x8xf32>
    %cst_26 = arith.constant dense<0xFF800000> : vector<8xf32>
    %79 = vector.multi_reduction <maximumf>, %78, %cst_26 [1] : vector<8x8xf32> to vector<8xf32>
    %80 = vector.shape_cast %79 : vector<8xf32> to vector<8x1xf32>
    %81 = vector.broadcast %80 : vector<8x1xf32> to vector<8x8xf32>
    %82 = arith.subf %78, %81 : vector<8x8xf32>
    %83 = math.exp %82 : vector<8x8xf32>
    %cst_27 = arith.constant dense<0.000000e+00> : vector<8xf32>
    %84 = vector.multi_reduction <add>, %83, %cst_27 [1] : vector<8x8xf32> to vector<8xf32>
    %85 = vector.shape_cast %84 : vector<8xf32> to vector<8x1xf32>
    %86 = tpu.reciprocal %85 {approx = true} : vector<8x1xf32> -> vector<8x1xf32>
    %87 = vector.broadcast %86 : vector<8x1xf32> to vector<8x8xf32>
    %88 = arith.mulf %83, %87 : vector<8x8xf32>
    %cst_28 = arith.constant dense<0.000000e+00> : vector<8x8xf32>
    %89 = tpu.matmul %88, %75, %cst_28 {dimension_numbers = #tpu.dot_dimension_numbers<[1], [0], [0], [1], [0, 0, 1, 1], [], []>} : vector<8x8xf32>, vector<8x8xf32>, vector<8x8xf32> -> vector<8x8xf32>
    %90 = vector.extract_strided_slice %38 {offsets = [0, 24], sizes = [8, 8], strides = [1, 1]} : vector<8x96xf32> to vector<8x8xf32>
    %91 = vector.extract_strided_slice %38 {offsets = [0, 56], sizes = [8, 8], strides = [1, 1]} : vector<8x96xf32> to vector<8x8xf32>
    %92 = vector.extract_strided_slice %38 {offsets = [0, 88], sizes = [8, 8], strides = [1, 1]} : vector<8x96xf32> to vector<8x8xf32>
    %cst_29 = arith.constant dense<0.000000e+00> : vector<8x8xf32>
    %93 = tpu.matmul %90, %91, %cst_29 {dimension_numbers = #tpu.dot_dimension_numbers<[1], [1], [0], [0], [0, 0, 1, 0], [], []>} : vector<8x8xf32>, vector<8x8xf32>, vector<8x8xf32> -> vector<8x8xf32>
    %94 = vector.broadcast %7 : vector<1x8xf32> to vector<8x8xf32>
    %95 = arith.addf %93, %94 : vector<8x8xf32>
    %cst_30 = arith.constant dense<0xFF800000> : vector<8xf32>
    %96 = vector.multi_reduction <maximumf>, %95, %cst_30 [1] : vector<8x8xf32> to vector<8xf32>
    %97 = vector.shape_cast %96 : vector<8xf32> to vector<8x1xf32>
    %98 = vector.broadcast %97 : vector<8x1xf32> to vector<8x8xf32>
    %99 = arith.subf %95, %98 : vector<8x8xf32>
    %100 = math.exp %99 : vector<8x8xf32>
    %cst_31 = arith.constant dense<0.000000e+00> : vector<8xf32>
    %101 = vector.multi_reduction <add>, %100, %cst_31 [1] : vector<8x8xf32> to vector<8xf32>
    %102 = vector.shape_cast %101 : vector<8xf32> to vector<8x1xf32>
    %103 = tpu.reciprocal %102 {approx = true} : vector<8x1xf32> -> vector<8x1xf32>
    %104 = vector.broadcast %103 : vector<8x1xf32> to vector<8x8xf32>
    %105 = arith.mulf %100, %104 : vector<8x8xf32>
    %cst_32 = arith.constant dense<0.000000e+00> : vector<8x8xf32>
    %106 = tpu.matmul %105, %92, %cst_32 {dimension_numbers = #tpu.dot_dimension_numbers<[1], [0], [0], [1], [0, 0, 1, 1], [], []>} : vector<8x8xf32>, vector<8x8xf32>, vector<8x8xf32> -> vector<8x8xf32>
    %107 = tpu.concatenate %55, %72, %89, %106 in 1 : vector<8x8xf32>, vector<8x8xf32>, vector<8x8xf32>, vector<8x8xf32> -> vector<8x32xf32>
    %c0_33 = arith.constant 0 : index
    %c0_34 = arith.constant 0 : index
    %108 = vector.load %arg7[%c0_33, %c0_34] : memref<32x32xf32, #tpu.memory_space<vmem>>, vector<32x32xf32>
    %cst_35 = arith.constant dense<0.000000e+00> : vector<8x32xf32>
    %109 = tpu.matmul %107, %108, %cst_35 {dimension_numbers = #tpu.dot_dimension_numbers<[1], [0], [0], [1], [0, 0, 1, 1], [], []>} : vector<8x32xf32>, vector<32x32xf32>, vector<8x32xf32> -> vector<8x32xf32>
    %c0_36 = arith.constant 0 : index
    %c0_37 = arith.constant 0 : index
    %110 = vector.load %arg8[%c0_36, %c0_37] : memref<1x32xf32, #tpu.memory_space<vmem>>, vector<1x32xf32>
    %111 = vector.broadcast %110 : vector<1x32xf32> to vector<8x32xf32>
    %112 = arith.addf %109, %111 : vector<8x32xf32>
    %113 = arith.addf %33, %112 : vector<8x32xf32>
    %c0_38 = arith.constant 0 : index
    %c0_39 = arith.constant 0 : index
    %114 = vector.load %arg9[%c0_38, %c0_39] : memref<1x32xf32, #tpu.memory_space<vmem>>, vector<1x32xf32>
    %c0_40 = arith.constant 0 : index
    %c0_41 = arith.constant 0 : index
    %115 = vector.load %arg10[%c0_40, %c0_41] : memref<1x32xf32, #tpu.memory_space<vmem>>, vector<1x32xf32>
    %cst_42 = arith.constant dense<0.000000e+00> : vector<8xf32>
    %116 = vector.multi_reduction <add>, %113, %cst_42 [1] : vector<8x32xf32> to vector<8xf32>
    %117 = vector.shape_cast %116 : vector<8xf32> to vector<8x1xf32>
    %cst_43 = arith.constant 3.200000e+01 : f32
    %118 = vector.broadcast %cst_43 : f32 to vector<8x1xf32>
    %119 = arith.divf %117, %118 : vector<8x1xf32>
    %120 = vector.broadcast %119 : vector<8x1xf32> to vector<8x32xf32>
    %121 = arith.subf %113, %120 : vector<8x32xf32>
    %122 = arith.mulf %121, %121 : vector<8x32xf32>
    %cst_44 = arith.constant dense<0.000000e+00> : vector<8xf32>
    %123 = vector.multi_reduction <add>, %122, %cst_44 [1] : vector<8x32xf32> to vector<8xf32>
    %124 = vector.shape_cast %123 : vector<8xf32> to vector<8x1xf32>
    %cst_45 = arith.constant 3.200000e+01 : f32
    %125 = vector.broadcast %cst_45 : f32 to vector<8x1xf32>
    %126 = arith.divf %124, %125 : vector<8x1xf32>
    %127 = vector.broadcast %119 : vector<8x1xf32> to vector<8x32xf32>
    %128 = arith.subf %113, %127 : vector<8x32xf32>
    %cst_46 = arith.constant 9.99999996E-13 : f32
    %129 = vector.broadcast %cst_46 : f32 to vector<8x1xf32>
    %130 = arith.addf %126, %129 : vector<8x1xf32>
    %131 = math.rsqrt %130 : vector<8x1xf32>
    %132 = vector.broadcast %131 : vector<8x1xf32> to vector<8x32xf32>
    %133 = arith.mulf %128, %132 : vector<8x32xf32>
    %134 = vector.broadcast %114 : vector<1x32xf32> to vector<8x32xf32>
    %135 = arith.mulf %133, %134 : vector<8x32xf32>
    %136 = vector.broadcast %115 : vector<1x32xf32> to vector<8x32xf32>
    %137 = arith.addf %135, %136 : vector<8x32xf32>
    %c0_47 = arith.constant 0 : index
    %c0_48 = arith.constant 0 : index
    %138 = vector.load %arg11[%c0_47, %c0_48] : memref<32x64xf32, #tpu.memory_space<vmem>>, vector<32x64xf32>
    %cst_49 = arith.constant dense<0.000000e+00> : vector<8x64xf32>
    %139 = tpu.matmul %137, %138, %cst_49 {dimension_numbers = #tpu.dot_dimension_numbers<[1], [0], [0], [1], [0, 0, 1, 1], [], []>} : vector<8x32xf32>, vector<32x64xf32>, vector<8x64xf32> -> vector<8x64xf32>
    %c0_50 = arith.constant 0 : index
    %c0_51 = arith.constant 0 : index
    %140 = vector.load %arg12[%c0_50, %c0_51] : memref<1x64xf32, #tpu.memory_space<vmem>>, vector<1x64xf32>
    %141 = vector.broadcast %140 : vector<1x64xf32> to vector<8x64xf32>
    %142 = arith.addf %139, %141 : vector<8x64xf32>
    %cst_52 = arith.constant 5.000000e-01 : f32
    %143 = vector.broadcast %cst_52 : f32 to vector<8x64xf32>
    %144 = arith.mulf %143, %142 : vector<8x64xf32>
    %cst_53 = arith.constant 4.471500e-02 : f32
    %145 = vector.broadcast %cst_53 : f32 to vector<8x64xf32>
    %146 = arith.mulf %145, %142 : vector<8x64xf32>
    %147 = arith.mulf %146, %142 : vector<8x64xf32>
    %148 = arith.mulf %147, %142 : vector<8x64xf32>
    %149 = arith.addf %142, %148 : vector<8x64xf32>
    %cst_54 = arith.constant 0.797884583 : f32
    %150 = vector.broadcast %cst_54 : f32 to vector<8x64xf32>
    %151 = arith.mulf %150, %149 : vector<8x64xf32>
    %152 = math.tanh %151 : vector<8x64xf32>
    %cst_55 = arith.constant 1.000000e+00 : f32
    %153 = vector.broadcast %cst_55 : f32 to vector<8x64xf32>
    %154 = arith.addf %153, %152 : vector<8x64xf32>
    %155 = arith.mulf %144, %154 : vector<8x64xf32>
    %c0_56 = arith.constant 0 : index
    %c0_57 = arith.constant 0 : index
    %156 = vector.load %arg13[%c0_56, %c0_57] : memref<64x32xf32, #tpu.memory_space<vmem>>, vector<64x32xf32>
    %cst_58 = arith.constant dense<0.000000e+00> : vector<8x32xf32>
    %157 = tpu.matmul %155, %156, %cst_58 {dimension_numbers = #tpu.dot_dimension_numbers<[1], [0], [0], [1], [0, 0, 1, 1], [], []>} : vector<8x64xf32>, vector<64x32xf32>, vector<8x32xf32> -> vector<8x32xf32>
    %c0_59 = arith.constant 0 : index
    %c0_60 = arith.constant 0 : index
    %158 = vector.load %arg14[%c0_59, %c0_60] : memref<1x32xf32, #tpu.memory_space<vmem>>, vector<1x32xf32>
    %159 = vector.broadcast %158 : vector<1x32xf32> to vector<8x32xf32>
    %160 = arith.addf %157, %159 : vector<8x32xf32>
    %161 = arith.addf %137, %160 : vector<8x32xf32>
    %c0_61 = arith.constant 0 : index
    %c0_62 = arith.constant 0 : index
    %162 = vector.load %arg15[%c0_61, %c0_62] : memref<1x32xf32, #tpu.memory_space<vmem>>, vector<1x32xf32>
    %c0_63 = arith.constant 0 : index
    %c0_64 = arith.constant 0 : index
    %163 = vector.load %arg16[%c0_63, %c0_64] : memref<1x32xf32, #tpu.memory_space<vmem>>, vector<1x32xf32>
    %cst_65 = arith.constant dense<0.000000e+00> : vector<8xf32>
    %164 = vector.multi_reduction <add>, %161, %cst_65 [1] : vector<8x32xf32> to vector<8xf32>
    %165 = vector.shape_cast %164 : vector<8xf32> to vector<8x1xf32>
    %cst_66 = arith.constant 3.200000e+01 : f32
    %166 = vector.broadcast %cst_66 : f32 to vector<8x1xf32>
    %167 = arith.divf %165, %166 : vector<8x1xf32>
    %168 = vector.broadcast %167 : vector<8x1xf32> to vector<8x32xf32>
    %169 = arith.subf %161, %168 : vector<8x32xf32>
    %170 = arith.mulf %169, %169 : vector<8x32xf32>
    %cst_67 = arith.constant dense<0.000000e+00> : vector<8xf32>
    %171 = vector.multi_reduction <add>, %170, %cst_67 [1] : vector<8x32xf32> to vector<8xf32>
    %172 = vector.shape_cast %171 : vector<8xf32> to vector<8x1xf32>
    %cst_68 = arith.constant 3.200000e+01 : f32
    %173 = vector.broadcast %cst_68 : f32 to vector<8x1xf32>
    %174 = arith.divf %172, %173 : vector<8x1xf32>
    %175 = vector.broadcast %167 : vector<8x1xf32> to vector<8x32xf32>
    %176 = arith.subf %161, %175 : vector<8x32xf32>
    %cst_69 = arith.constant 9.99999996E-13 : f32
    %177 = vector.broadcast %cst_69 : f32 to vector<8x1xf32>
    %178 = arith.addf %174, %177 : vector<8x1xf32>
    %179 = math.rsqrt %178 : vector<8x1xf32>
    %180 = vector.broadcast %179 : vector<8x1xf32> to vector<8x32xf32>
    %181 = arith.mulf %176, %180 : vector<8x32xf32>
    %182 = vector.broadcast %162 : vector<1x32xf32> to vector<8x32xf32>
    %183 = arith.mulf %181, %182 : vector<8x32xf32>
    %184 = vector.broadcast %163 : vector<1x32xf32> to vector<8x32xf32>
    %185 = arith.addf %183, %184 : vector<8x32xf32>
    %186 = vector.extract_strided_slice %185 {offsets = [0, 0], sizes = [1, 32], strides = [1, 1]} : vector<8x32xf32> to vector<1x32xf32>
    %c0_70 = arith.constant 0 : index
    %c0_71 = arith.constant 0 : index
    %187 = vector.load %arg17[%c0_70, %c0_71] : memref<32x32xf32, #tpu.memory_space<vmem>>, vector<32x32xf32>
    %cst_72 = arith.constant dense<0.000000e+00> : vector<1x32xf32>
    %188 = tpu.matmul %186, %187, %cst_72 {dimension_numbers = #tpu.dot_dimension_numbers<[1], [0], [0], [1], [0, 0, 1, 1], [], []>} : vector<1x32xf32>, vector<32x32xf32>, vector<1x32xf32> -> vector<1x32xf32>
    %c0_73 = arith.constant 0 : index
    %c0_74 = arith.constant 0 : index
    %189 = vector.load %arg18[%c0_73, %c0_74] : memref<1x32xf32, #tpu.memory_space<vmem>>, vector<1x32xf32>
    %190 = arith.addf %188, %189 : vector<1x32xf32>
    %191 = math.tanh %190 : vector<1x32xf32>
    %c0_75 = arith.constant 0 : index
    %c0_76 = arith.constant 0 : index
    %192 = vector.load %arg19[%c0_75, %c0_76] : memref<32x128xf32, #tpu.memory_space<vmem>>, vector<32x128xf32>
    %cst_77 = arith.constant dense<0.000000e+00> : vector<1x128xf32>
    %193 = tpu.matmul %191, %192, %cst_77 {dimension_numbers = #tpu.dot_dimension_numbers<[1], [0], [0], [1], [0, 0, 1, 1], [], []>} : vector<1x32xf32>, vector<32x128xf32>, vector<1x128xf32> -> vector<1x128xf32>
    %c0_78 = arith.constant 0 : index
    %c0_79 = arith.constant 0 : index
    %194 = vector.load %arg20[%c0_78, %c0_79] : memref<1x128xf32, #tpu.memory_space<vmem>>, vector<1x128xf32>
    %195 = arith.addf %193, %194 : vector<1x128xf32>
    %c0_80 = arith.constant 0 : index
    %c0_81 = arith.constant 0 : index
    %c0_82 = arith.constant 0 : index
    %196 = vector.load %arg21[%c0_80, %c0_81, %c0_82] : memref<1x1x128xf32, #tpu.memory_space<vmem>>, vector<1x1x128xf32>
    %197 = vector.shape_cast %196 : vector<1x1x128xf32> to vector<1x128xf32>
    %198 = vector.shape_cast %195 : vector<1x128xf32> to vector<1x1x128xf32>
    tpu.vector_store %arg21[%c0_80, %c0_81, %c0_82], %198 {strides = array<i32>} : memref<1x1x128xf32, #tpu.memory_space<vmem>>, vector<1x1x128xf32>,
    return
  }
  func.func @transform_0(%arg0: i32, %arg1: memref<2xi32, #tpu.memory_space<smem>>) -> (i32, i32, i32) {
    %c0_i32 = arith.constant 0 : i32
    %c0_i32_0 = arith.constant 0 : i32
    %c0_i32_1 = arith.constant 0 : i32
    return %arg0, %c0_i32, %c0_i32_0 : i32, i32, i32
  }
  func.func @transform_1(%arg0: i32, %arg1: memref<2xi32, #tpu.memory_space<smem>>) -> (i32, i32) {
    %c0_i32 = arith.constant 0 : i32
    %c0_i32_0 = arith.constant 0 : i32
    %c0_i32_1 = arith.constant 0 : i32
    return %c0_i32, %c0_i32_0 : i32, i32
  }
  func.func @transform_2(%arg0: i32, %arg1: memref<2xi32, #tpu.memory_space<smem>>) -> (i32, i32) {
    %c0_i32 = arith.constant 0 : i32
    %c0_i32_0 = arith.constant 0 : i32
    %c0_i32_1 = arith.constant 0 : i32
    return %c0_i32, %c0_i32_0 : i32, i32
  }
  func.func @transform_3(%arg0: i32, %arg1: memref<2xi32, #tpu.memory_space<smem>>) -> (i32, i32) {
    %c0_i32 = arith.constant 0 : i32
    %c0_i32_0 = arith.constant 0 : i32
    %c0_i32_1 = arith.constant 0 : i32
    return %c0_i32, %c0_i32_0 : i32, i32
  }
  func.func @transform_4(%arg0: i32, %arg1: memref<2xi32, #tpu.memory_space<smem>>) -> (i32, i32) {
    %c0_i32 = arith.constant 0 : i32
    %c0_i32_0 = arith.constant 0 : i32
    %c0_i32_1 = arith.constant 0 : i32
    return %c0_i32, %c0_i32_0 : i32, i32
  }
  func.func @transform_5(%arg0: i32, %arg1: memref<2xi32, #tpu.memory_space<smem>>) -> (i32, i32) {
    %c0_i32 = arith.constant 0 : i32
    %c0_i32_0 = arith.constant 0 : i32
    %c0_i32_1 = arith.constant 0 : i32
    return %c0_i32, %c0_i32_0 : i32, i32
  }
  func.func @transform_6(%arg0: i32, %arg1: memref<2xi32, #tpu.memory_space<smem>>) -> (i32, i32) {
    %c0_i32 = arith.constant 0 : i32
    %c0_i32_0 = arith.constant 0 : i32
    %c0_i32_1 = arith.constant 0 : i32
    return %c0_i32, %c0_i32_0 : i32, i32
  }
  func.func @transform_7(%arg0: i32, %arg1: memref<2xi32, #tpu.memory_space<smem>>) -> (i32, i32) {
    %c0_i32 = arith.constant 0 : i32
    %c0_i32_0 = arith.constant 0 : i32
    %c0_i32_1 = arith.constant 0 : i32
    return %c0_i32, %c0_i32_0 : i32, i32
  }
  func.func @transform_8(%arg0: i32, %arg1: memref<2xi32, #tpu.memory_space<smem>>) -> (i32, i32) {
    %c0_i32 = arith.constant 0 : i32
    %c0_i32_0 = arith.constant 0 : i32
    %c0_i32_1 = arith.constant 0 : i32
    return %c0_i32, %c0_i32_0 : i32, i32
  }
  func.func @transform_9(%arg0: i32, %arg1: memref<2xi32, #tpu.memory_space<smem>>) -> (i32, i32) {
    %c0_i32 = arith.constant 0 : i32
    %c0_i32_0 = arith.constant 0 : i32
    %c0_i32_1 = arith.constant 0 : i32
    return %c0_i32, %c0_i32_0 : i32, i32
  }
  func.func @transform_10(%arg0: i32, %arg1: memref<2xi32, #tpu.memory_space<smem>>) -> (i32, i32) {
    %c0_i32 = arith.constant 0 : i32
    %c0_i32_0 = arith.constant 0 : i32
    %c0_i32_1 = arith.constant 0 : i32
    return %c0_i32, %c0_i32_0 : i32, i32
  }
  func.func @transform_11(%arg0: i32, %arg1: memref<2xi32, #tpu.memory_space<smem>>) -> (i32, i32) {
    %c0_i32 = arith.constant 0 : i32
    %c0_i32_0 = arith.constant 0 : i32
    %c0_i32_1 = arith.constant 0 : i32
    return %c0_i32, %c0_i32_0 : i32, i32
  }
  func.func @transform_12(%arg0: i32, %arg1: memref<2xi32, #tpu.memory_space<smem>>) -> (i32, i32) {
    %c0_i32 = arith.constant 0 : i32
    %c0_i32_0 = arith.constant 0 : i32
    %c0_i32_1 = arith.constant 0 : i32
    return %c0_i32, %c0_i32_0 : i32, i32
  }
  func.func @transform_13(%arg0: i32, %arg1: memref<2xi32, #tpu.memory_space<smem>>) -> (i32, i32) {
    %c0_i32 = arith.constant 0 : i32
    %c0_i32_0 = arith.constant 0 : i32
    %c0_i32_1 = arith.constant 0 : i32
    return %c0_i32, %c0_i32_0 : i32, i32
  }
  func.func @transform_14(%arg0: i32, %arg1: memref<2xi32, #tpu.memory_space<smem>>) -> (i32, i32) {
    %c0_i32 = arith.constant 0 : i32
    %c0_i32_0 = arith.constant 0 : i32
    %c0_i32_1 = arith.constant 0 : i32
    return %c0_i32, %c0_i32_0 : i32, i32
  }
  func.func @transform_15(%arg0: i32, %arg1: memref<2xi32, #tpu.memory_space<smem>>) -> (i32, i32) {
    %c0_i32 = arith.constant 0 : i32
    %c0_i32_0 = arith.constant 0 : i32
    %c0_i32_1 = arith.constant 0 : i32
    return %c0_i32, %c0_i32_0 : i32, i32
  }
  func.func @transform_16(%arg0: i32, %arg1: memref<2xi32, #tpu.memory_space<smem>>) -> (i32, i32) {
    %c0_i32 = arith.constant 0 : i32
    %c0_i32_0 = arith.constant 0 : i32
    %c0_i32_1 = arith.constant 0 : i32
    return %c0_i32, %c0_i32_0 : i32, i32
  }
  func.func @transform_17(%arg0: i32, %arg1: memref<2xi32, #tpu.memory_space<smem>>) -> (i32, i32) {
    %c0_i32 = arith.constant 0 : i32
    %c0_i32_0 = arith.constant 0 : i32
    %c0_i32_1 = arith.constant 0 : i32
    return %c0_i32, %c0_i32_0 : i32, i32
  }
  func.func @transform_18(%arg0: i32, %arg1: memref<2xi32, #tpu.memory_space<smem>>) -> (i32, i32) {
    %c0_i32 = arith.constant 0 : i32
    %c0_i32_0 = arith.constant 0 : i32
    %c0_i32_1 = arith.constant 0 : i32
    return %c0_i32, %c0_i32_0 : i32, i32
  }
  func.func @transform_19(%arg0: i32, %arg1: memref<2xi32, #tpu.memory_space<smem>>) -> (i32, i32, i32) {
    %c0_i32 = arith.constant 0 : i32
    %c0_i32_0 = arith.constant 0 : i32
    %c0_i32_1 = arith.constant 0 : i32
    return %arg0, %c0_i32, %c0_i32_0 : i32, i32, i32
  }
}

</mosaic_0001>

<bundles_post_ra>
// kernel: bert_classifier_forward.1
= control target key start
LH: loop header
LB: loop body
LE: loop exit
PB: predicated region body
PF: predicated region fallthrough
CT: control target
= control target key end

     0   :  { %s2808_s0 = inlined_call_operand.vmem [shape: s32[2], index: 0, kind: input, shape index: {}]   ;;  %s2809_s1 = inlined_call_operand.vmem [shape: f32[2,8,32], index: 1, kind: input, shape index: {}]   ;;  %s2810_s2 = inlined_call_operand.vmem [shape: f32[1,32], index: 2, kind: input, shape index: {}]   ;;  %s2811_s3 = inlined_call_operand.vmem [shape: f32[1,32], index: 3, kind: input, shape index: {}]   ;;  %s2812_s4 = inlined_call_operand.vmem [shape: f32[32,96], index: 4, kind: input, shape index: {}]   ;;  %s2813_s5 = inlined_call_operand.vmem [shape: f32[1,96], index: 5, kind: input, shape index: {}]   ;;  %s2814_s6 = inlined_call_operand.vmem [shape: f32[32,32], index: 6, kind: input, shape index: {}]   ;;  %s2815_s7 = inlined_call_operand.vmem [shape: f32[1,32], index: 7, kind: input, shape index: {}]   ;;  %s2816_s8 = inlined_call_operand.vmem [shape: f32[1,32], index: 8, kind: input, shape index: {}]   ;;  %s2817_s9 = inlined_call_operand.vmem [shape: f32[1,32], index: 9, kind: input, shape index: {}]   ;;  %s2818_s10 = inlined_call_operand.vmem [shape: f32[32,64], index: 10, kind: input, shape index: {}]   ;;  %s2819_s11 = inlined_call_operand.vmem [shape: f32[1,64], index: 11, kind: input, shape index: {}]   ;;  %s2820_s12 = inlined_call_operand.vmem [shape: f32[64,32], index: 12, kind: input, shape index: {}]   ;;  %s2821_s13 = inlined_call_operand.vmem [shape: f32[1,32], index: 13, kind: input, shape index: {}]   ;;  %s2822_s14 = inlined_call_operand.vmem [shape: f32[1,32], index: 14, kind: input, shape index: {}]   ;;  %s2823_s15 = inlined_call_operand.vmem [shape: f32[1,32], index: 15, kind: input, shape index: {}]   ;;  %s2824_s16 = inlined_call_operand.vmem [shape: f32[32,32], index: 16, kind: input, shape index: {}]   ;;  %s2825_s17 = inlined_call_operand.vmem [shape: f32[1,32], index: 17, kind: input, shape index: {}]   ;;  %s2826_s18 = inlined_call_operand.vmem [shape: f32[32,128], index: 18, kind: input, shape index: {}]   ;;  %s2827_s19 = inlined_call_operand.vmem [shape: f32[1,128], index: 19, kind: input, shape index: {}]   ;;  %s2828_s20 = inlined_call_operand.hbm [shape: f32[2,1,128], index: 20, kind: output, shape index: {}]  }
   0x1   :  { %2835 = sst [smem:[#allocation12_spill]] %s2808_s0 }
   0x2   :  { %2836 = sst [smem:[#allocation13_spill]] %s2809_s1  ;;  %s2841_s23 = sld [smem:[#allocation12_spill]] }
   0x3   :  { %2837 = sst [smem:[#allocation14_spill]] %s2810_s2 }
   0x4   :  { %2838 = sst [smem:[#allocation15_spill]] %s2811_s3 }
   0x5   :  { %2839 = sst [smem:[#allocation16_spill]] %s2812_s4 }
   0x6   :  { %2840 = sst [smem:[#allocation17_spill]] %s2822_s14 }
   0x8   :  { %s25_s14 = sshll.u32 %s2841_s23, 4  ;;  %s26_s14 = int_to_ptr.vmem [resolvable:$true] %s25_s14 }
   0x9   :  { %s2281_s24 = scalar_lea.vmem %s26_s14, 16  ;;  %p2286_p1 = scmp.lt.s32.totalorder %s26_s14, %s26_s14 }
   0xa   :  { %p2282_p0 = scmp.ne.s32.totalorder %s26_s14, %s2281_s24  ;;  %p2287_p2 = scmp.lt.s32.totalorder %s2281_s24, %s2281_s24 }
   0xc   :  { %p2288_p3 = por %p2287_p2, %p2286_p1 }
   0xe   :  { %p2289_p4 = pnand %p2288_p3, %p2282_p0 }
  0x10   :  { %2292 = shalt.err (!%p2289_p4)  }
  0x11   :  { %s2359_s2 = smov [#allocation3]  }
  0x12   :  { %28 = dma.vmem_to_smem %s26_s14, 16, %s2359_s2, [#allocation2] }
  0x13   :  { %2337 = dma.done.wait [#allocation2], 16 }
  0x14   :  { %2338 = vsyncadd [#allocation2], 4294967280 }
  0x15   :  { %30 = sfence }
  0x16   :  { %31 = vsyncpa [#allocation5], 0 }
  0x17   :  { %33 = vsyncpa [#allocation5 + $0x1], 0  ;;  %s2487_s25 = smov 0   ;;  %s2489_s3 = smov 0  }
  0x18   :  { %s2491_s26 = smov 0   ;;  %s2493_s27 = smov 0  }
  0x19 LB: > { %2842 = sst [smem:[#allocation8_spill]] %s2353_s26  ;;  %s2508_s14 = sadd.s32 4294967295, %s2357_s27   ;;  %s2357_s27 = sphi %s2493_s27, %s2855_s27   ;;  %s2353_s26 = sphi %s2491_s26, %s2857_s26   ;;  %s2349_s3 = sphi %s2489_s3, %s2859_s3   ;;  %s2345_s25 = sphi %s2487_s25, %s2858_s25  }
  0x1a   : > { %s1955_s28 = sadd.s32 4294967294, %s2357_s27   ;;  %s2512_s4 = sadd.s32 1, %s2357_s27  }
  0x1b   : > { %2843 = sst [smem:[#allocation9_spill]] %s2512_s4  ;;  %s450_s29 = sadd.s32 1, %s2353_s26 }
  0x1c   : > { %s447_s30 = ssub.s32 %s2357_s27, %s2512_s4  ;;  %p460_p5 = scmp.ne.s32.totalorder %s2353_s26, %s2349_s3 }
  0x1d   : > { %p448_p6 = scmp.eq.s32.totalorder %s447_s30, 0  ;;  %p461_p7 = scmp.eq.s32.totalorder %s2508_s14, 1 }
  0x1e   : > { %p466_p8 = scmp.ne.s32.totalorder %s2349_s3, %s2345_s25  ;;  %p467_p9 = scmp.eq.s32.totalorder %s1955_s28, 1 }
  0x1f   : > { %s2523_s0 = scalar_select %p448_p6, %s2353_s26, %s450_s29  }
  0x20   : > { %p2525_p10 = por %p461_p7, %p460_p5  ;;  %p2529_p11 = por %p467_p9, %p466_p8 }
  0x21   : > { %2844 = sst [smem:[#allocation10_spill]] %s2523_s0  ;;  %p1958_p12 = scmp.ge.s32.totalorder %s2357_s27, 1 }
  0x22   : > { %s2846_s1 = scalar_select %p2529_p11, 1, 0 }
  0x23   : > { %p546_p13 = scmp.lt.s32.totalorder %s2357_s27, 3 }
  0x24   : > { %2847 = sst [smem:[#allocation11_spill]] %s2846_s1 }
  0x25   : > { %p547_p0 = pnand %p1958_p12, %p546_p13 }
  0x26   : > { %p600_p1 = scmp.lt.s32.totalorder (!%p547_p0), %s2508_s14, 1  ;;  %vm613_vm0 = vcmask (!%p547_p0), 261120   ;;  %s2848_s28 = sld [smem:[#allocation13_spill]] (!%p547_p0)  ;;  %v2360_v10 = vmov (!%p547_p0), 0.0|0.0   ;;  %vm2361_vm1 = vmmov (!%p547_p0), 0   ;;  %v2362_v13 = vmov (!%p547_p0), 0.0  }
  0x27   : > { %550 = sbr.rel (%p547_p0) target bundleno = 3319 (0xcf7), region = 96  ;;  %s2849_s26 = sld [smem:[#allocation16_spill]] (!%p547_p0)  ;;  %2155 = vmatprep.subr.bf16.mxu0 (!%p547_p0), %v2360_v10  ;;  %2049 = vmatprep.mubr.msk.f32.mxu0 (!%p547_p0), %vm2361_vm1, %v2362_v13  ;;  %v1962_v24 = vld [vmem:[%s2813_s5] ss:$0 sm:$0xff] (!%p547_p0)  ;;  %vm729_vm2 = vcmask (!%p547_p0), 64512   ;;  %v605_v35 = vlaneseq (!%p547_p0)  ;;  %v2370_v38 = vmov (!%p547_p0), -10000.0  }
  0x28   : > { %2052 = vmatprep.subr.mxu1 (!%p547_p0), %v2362_v13  ;;  %2054 = vmatprep.mubr.msk.f32.mxu1 (!%p547_p0), %vm2361_vm1, %v2362_v13  ;;  %s2851_s1 = sld [smem:[#allocation14_spill]] (!%p547_p0)  ;;  %s2363_s2 = smov (!%p547_p0), 120   ;;  %vm1399_vm4 = vcmask (!%p547_p0), 130048   ;;  %vm1401_vm5 = vcmask (!%p547_p0), 195584   ;;  %vm1625_vm6 = vcmask (!%p547_p0), 523264  }
  0x29   : > { %s2366_s0 = smov (!%p547_p0), 80   ;;  %s2369_s30 = smov (!%p547_p0), 104   ;;  %v606_v36 = vand.u32 (!%p547_p0), 127, %v605_v35 }
  0x2a   : > { %s2372_s24 = smov (!%p547_p0), 48  }
  0x2d   : > { %s2850_s4 = smov (!%p547_p0), %s2849_s26  ;;  %v642_v7 = vld [vmem:[%s2849_s26] sm:$0xff] (!%p547_p0)  ;;  %s2365_s26 = smov (!%p547_p0), 88  }
  0x2e   : > { %s601_s22 = scalar_select %p600_p1, %s2508_s14, 1  ;;  %v643_v8 = vld [vmem:[%s2850_s4 + $0x8] sm:$0xff]  ;;  %v644_v9 = vld [vmem:[%s2850_s4 + $0x10] sm:$0xff]  ;;  %v645_v12 = vld [vmem:[%s2850_s4 + $0x18] sm:$0xff] }
  0x2f   : > { %v2156_v11 = vpack.c.bf16 %v643_v8, %v642_v7  ;;  %v2159_v14 = vpack.c.bf16 %v645_v12, %v644_v9  ;;  %v1960_v19 = vld [vmem:[%s2851_s1] ss:$0 sm:$0xff]  ;;  %s2367_s1 = smov 112  }
  0x30   : > { %s1959_s23 = sshll.u32 %s601_s22, 3  ;;  %s2852_s22 = sld [smem:[#allocation15_spill]] }
  0x31   : > { %s603_s29 = scalar_lea.vmem %s2848_s28, %s1959_s23  ;;  %2157 = vmatpush3.bf16.msra.mxu0 %v2156_v11  ;;  %s2364_s28 = smov 96  }
  0x32   : > { %v610_v0 = vld [vmem:[%s603_s29] sm:$0xff]  ;;  %2158 = vmatprep.subr.bf16.mxu0 %v2360_v10  ;;  %s2368_s29 = smov 72   ;;  %s2371_s23 = smov 64  }
  0x33   : > { %v614_v1 = vsel %vm613_vm0, %v610_v0, 0.0 }
  0x34   : > { %615 = vadd.xlane.f32.xlu0 %v614_v1 }
  0x35   : > { %2160 = vmatpush3.bf16.msra.mxu0 %v2159_v14 }
  0x36   : > { %2062 = vmatprep.subr.mxu0 %v2362_v13  ;;  %v1961_v21 = vld [vmem:[%s2852_s22] ss:$0 sm:$0xff]  ;;  %s604_s22 = sld [smem:[#allocation3 + %s2508_s14]] }
  0x3c   : > { %v607_v37 = vstv %s604_s22  ;;  %s2853_s22 = sld [smem:[#allocation17_spill]] }
  0x3d   : > { %vm608_vm3 = vcmp.lt.s32.totalorder %v606_v36, %v607_v37  ;;  %v1405_v36 = vld [vmem:[%s2814_s6 + $0x10] sm:$0xff]  ;;  %v1406_v37 = vld [vmem:[%s2814_s6 + $0x18] sm:$0xff] }
  0x3e   : > { %v609_v39 = vsel %vm608_vm3, 0.0, %v2370_v38  ;;  %v2165_v38 = vpack.c.bf16 %v1406_v37, %v1405_v36 }
  0xc1   : > { %v616_v2 = vpop.xlane.xlu0 %615 }
  0xc2   : > { %v618_v3 = vmul.f32 0.03125, %v616_v2 }
  0xc4   : > { %v619_v4 = vsub.f32 %v610_v0, %v618_v3 }
  0xc6   : > { %v620_v5 = vmul.f32 %v619_v4, %v619_v4 }
  0xc8   : > { %v621_v6 = vsel %vm613_vm0, %v620_v5, 0.0 }
  0xc9   : > { %622 = vadd.xlane.f32.xlu0 %v621_v6 }
 0x156   : > { %v623_v15 = vpop.xlane.xlu0 %622 }
 0x157   : > { %v624_v16 = vmul.f32 0.03125, %v623_v15 }
 0x159   : > { %v625_v17 = vadd.f32 1e-12, %v624_v16 }
 0x15b   : > { %2255 = vrsqrt.f32 %v625_v17 }
 0x165   : > { %v2256_v18 = vpop.eup %2255 }
 0x166   : > { %v627_v20 = vmul.f32 %v2256_v18, %v619_v4 }
 0x168   : > { %v634_v22 = vmul.f32 %v1960_v19, %v627_v20 }
 0x16a   : > { %v2568_v23 = vadd.f32 %v1961_v21, %v634_v22 }
 0x16c   : > { %2050 = vmatmul.mubr.msk.f32.vlgmr.msra.gmra.mrb[0].mxu0 %vm613_vm0, %v2568_v23 }
 0x16d   : > { %2064 = vmatprep.mubr.msk.f32.mxu0 %vm2361_vm1, %v2362_v13 }
 0x23f   : > { %v722_v25 = vpop.f32.mrb[0].mxu0 }
 0x240   : > { %v2577_v26 = vadd.f32 %v1962_v24, %v722_v25  ;;  %v2051_v27 = vpop.f32.mrb[1].mxu0 }
 0x242   : > { %891 = vrot.lane.b32.xlu0 %v2577_v26, %s2363_s2  ;;  %727 = vrot.lane.b32.xlu1 %v2577_v26, %s2364_s28  ;;  %s2373_s2 = smov 40   ;;  %s2374_s28 = smov 56  }
 0x246   : > { %893 = vrot.lane.b32.xlu1 %v2577_v26, %s2365_s26  ;;  %s2377_s26 = smov 24  }
 0x24a   : > { %1058 = vrot.lane.b32.xlu1 %v2577_v26, %s2366_s0  ;;  %s1988_s0 = sshll.u32 %s2508_s14, 4  ;;  %s2378_s14 = smov [#allocation4]  }
 0x24e   : > { %1056 = vrot.lane.b32.xlu1 %v2577_v26, %s2367_s1 }
 0x252   : > { %1223 = vrot.lane.b32.xlu1 %v2577_v26, %s2368_s29 }
 0x256   : > { %1221 = vrot.lane.b32.xlu1 %v2577_v26, %s2369_s30 }
 0x2b4   : > { %v728_v28 = vpop.permute.xlu1 %727  ;;  %v892_v30 = vpop.permute.xlu0 %891 }
 0x2b5   : > { %2053 = vmatpush3.xpose.msk.msra.mxu1 %vm729_vm2, %v728_v28 }
 0x2b6   : > { %2057 = vmatprep.subr.mxu1 %v2362_v13 }
 0x2b8   : > { %2055 = vmatmul.mubr.msk.f32.vlgmr.msra.gmra.mrb[0].mxu1 %vm729_vm2, %v2577_v26  ;;  %v894_v29 = vpop.permute.xlu1 %893 }
 0x2b9   : > { %2063 = vmatpush3.xpose.msk.msra.mxu0 %vm729_vm2, %v894_v29  ;;  %2059 = vmatprep.mubr.msk.f32.mxu1 %vm2361_vm1, %v2362_v13 }
 0x2ba   : > { %2072 = vmatprep.subr.mxu0 %v2362_v13 }
 0x2bc   : > { %2065 = vmatmul.mubr.msk.f32.vlgmr.msra.gmra.mrb[2].mxu0 %vm729_vm2, %v892_v30  ;;  %v1059_v31 = vpop.permute.xlu1 %1058 }
 0x2bd   : > { %2073 = vmatpush3.xpose.msk.msra.mxu0 %vm729_vm2, %v1059_v31  ;;  %2074 = vmatprep.mubr.msk.f32.mxu0 %vm2361_vm1, %v2362_v13  ;;  %v1403_v31 = vld [vmem:[%s2814_s6] sm:$0xff] }
 0x2be   : > { %2082 = vmatprep.subr.mxu0 %v2362_v13 }
 0x2c0   : > { %v1057_v32 = vpop.permute.xlu1 %1056 }
 0x2c1   : > { %2075 = vmatmul.mubr.msk.f32.vlgmr.msra.gmra.mrb[4].mxu0 %vm729_vm2, %v1057_v32  ;;  %v1404_v32 = vld [vmem:[%s2814_s6 + $0x8] sm:$0xff] }
 0x2c2   : > { %2084 = vmatprep.mubr.msk.f32.mxu0 %vm2361_vm1, %v2362_v13 }
 0x2c4   : > { %v1224_v33 = vpop.permute.xlu1 %1223 }
 0x2c5   : > { %2083 = vmatpush3.xpose.msk.msra.mxu0 %vm729_vm2, %v1224_v33  ;;  %v2162_v33 = vpack.c.bf16 %v1404_v32, %v1403_v31 }
 0x2c6   : > { %2161 = vmatprep.subr.bf16.mxu0 %v2360_v10 }
 0x2c8   : > { %v1222_v34 = vpop.permute.xlu1 %1221 }
 0x2c9   : > { %2085 = vmatmul.mubr.msk.f32.vlgmr.msra.gmra.mrb[6].mxu0 %vm729_vm2, %v1222_v34 }
 0x2ca   : > { %2100 = vmatprep.mubr.msk.f32.mxu0 %vm2361_vm1, %v2362_v13  ;;  %2163 = vmatpush3.bf16.msra.mxu0 %v2162_v33 }
 0x2cb   : > { %2164 = vmatprep.subr.bf16.mxu0 %v2360_v10 }
 0x2ce   : > { %2166 = vmatpush3.bf16.msra.mxu0 %v2165_v38 }
 0x2cf   : > { %2173 = vmatprep.subr.bf16.mxu0 %v2360_v10 }
 0x38b   : > { %v800_v40 = vpop.f32.mrb[0].mxu1 }
 0x38c   : > { %v801_v41 = vadd.f32 %v800_v40, %v609_v39  ;;  %v2056_v42 = vpop.f32.mrb[1].mxu1 }
 0x38e   : > { %v804_v43 = vsel %vm729_vm2, %v801_v41, -inf }
 0x38f   : > { %805 = vmax.xlane.f32.xlu1 %v804_v43  ;;  %v965_v44 = vpop.f32.mrb[2].mxu0 }
 0x390   : > { %v966_v45 = vadd.f32 %v965_v44, %v609_v39  ;;  %v2066_v46 = vpop.f32.mrb[3].mxu0 }
 0x392   : > { %v969_v47 = vsel %vm729_vm2, %v966_v45, -inf }
 0x393   : > { %970 = vmax.xlane.f32.xlu0 %v969_v47 }
 0x394   : > { %v1130_v48 = vpop.f32.mrb[4].mxu0 }
 0x395   : > { %v1131_v49 = vadd.f32 %v1130_v48, %v609_v39  ;;  %v2076_v50 = vpop.f32.mrb[5].mxu0 }
 0x397   : > { %v1134_v51 = vsel %vm729_vm2, %v1131_v49, -inf }
 0x398   : > { %1135 = vmax.xlane.f32.xlu1 %v1134_v51  ;;  %v1976_v51 = vld [vmem:[%s2815_s7] ss:$0 sm:$0xff] }
 0x39c   : > { %v1295_v52 = vpop.f32.mrb[6].mxu0 }
 0x39d   : > { %v1296_v53 = vadd.f32 %v1295_v52, %v609_v39  ;;  %v2086_v54 = vpop.f32.mrb[7].mxu0 }
 0x39f   : > { %v1299_v55 = vsel %vm729_vm2, %v1296_v53, -inf }
 0x3a0   : > { %1300 = vmax.xlane.f32.xlu0 %v1299_v55 }
 0x3a9   : > { %815 = vrot.lane.b32.xlu1 %v2577_v26, %s2371_s23  ;;  %s2766_s23 = scalar_lea.hbm %s2828_s20, %s1988_s0 }
 0x41c   : > { %v806_v56 = vpop.xlane.xlu1 %805 }
 0x41d   : > { %v807_v57 = vsub.f32 %v801_v41, %v806_v56 }
 0x41f   : > { %v808_v58 = vmul.f32 1.442695, %v807_v57 }
 0x420   : > { %v971_v59 = vpop.xlane.xlu0 %970 }
 0x421   : > { %2257 = vpow2.f32 %v808_v58  ;;  %v972_v60 = vsub.f32 %v966_v45, %v971_v59 }
 0x423   : > { %v973_v61 = vmul.f32 1.442695, %v972_v60 }
 0x425   : > { %2259 = vpow2.f32 %v973_v61  ;;  %v1136_v62 = vpop.xlane.xlu1 %1135 }
 0x426   : > { %v1137_v63 = vsub.f32 %v1131_v49, %v1136_v62  ;;  %v1517_v62 = vld [vmem:[%s2818_s10] sm:$0xff] }
 0x428   : > { %v1138_v0 = vmul.f32 1.442695, %v1137_v63  ;;  %v1518_v63 = vld [vmem:[%s2818_s10 + $0x8] sm:$0xff] }
 0x429   : > { %v816_v1 = vpop.permute.xlu1 %815 }
 0x42a   : > { %2261 = vpow2.f32 %v1138_v0  ;;  %2058 = vmatpush3.msra.mxu1 %v816_v1  ;;  %v2168_v0 = vpack.c.bf16 %v1518_v63, %v1517_v62  ;;  %v1520_v1 = vld [vmem:[%s2818_s10 + $0x18] sm:$0xff]  ;;  %v1985_v63 = vld [vmem:[%s2823_s15] ss:$0 sm:$0xff] }
 0x42b   : > { %v2258_v2 = vpop.eup %2257  ;;  %2067 = vmatprep.subr.mxu1 %v2362_v13 }
 0x42c   : > { %v810_v3 = vsel %vm729_vm2, %v2258_v2, 0.0 }
 0x42d   : > { %811 = vadd.xlane.f32.xlu1 %v810_v3  ;;  %v1301_v4 = vpop.xlane.xlu0 %1300 }
 0x42e   : > { %v1302_v5 = vsub.f32 %v1296_v53, %v1301_v4 }
 0x42f   : > { %v2260_v6 = vpop.eup %2259 }
 0x430   : > { %v1303_v7 = vmul.f32 1.442695, %v1302_v5  ;;  %v975_v8 = vsel %vm729_vm2, %v2260_v6, 0.0 }
 0x431   : > { %976 = vadd.xlane.f32.xlu0 %v975_v8 }
 0x432   : > { %2263 = vpow2.f32 %v1303_v7  ;;  %v1978_v7 = vld [vmem:[%s2816_s8] ss:$0 sm:$0xff] }
 0x434   : > { %v2262_v9 = vpop.eup %2261 }
 0x435   : > { %v1140_v11 = vsel %vm729_vm2, %v2262_v9, 0.0 }
 0x436   : > { %1141 = vadd.xlane.f32.xlu1 %v1140_v11 }
 0x43c   : > { %v2264_v12 = vpop.eup %2263 }
 0x43d   : > { %v1305_v14 = vsel %vm729_vm2, %v2264_v12, 0.0 }
 0x43e   : > { %1306 = vadd.xlane.f32.xlu0 %v1305_v14  ;;  %v1610_v14 = vld [vmem:[%s2820_s12] sm:$0xff] }
 0x447   : > { %1145 = vrot.lane.b32.xlu1 %v2577_v26, %s2372_s24 }
 0x44b   : > { %1310 = vrot.lane.b32.xlu1 %v2577_v26, %s2373_s2  ;;  %s2375_s2 = smov 8  }
 0x454   : > { %980 = vrot.lane.b32.xlu0 %v2577_v26, %s2374_s28  ;;  %s2376_s28 = smov 16  }
 0x4ba   : > { %v812_v15 = vpop.xlane.xlu1 %811 }
 0x4bb   : > { %2265 = vrcp.f32 %v812_v15  ;;  %v1611_v15 = vld [vmem:[%s2820_s12 + $0x8] sm:$0xff] }
 0x4be   : > { %v977_v16 = vpop.xlane.xlu0 %976 }
 0x4bf   : > { %2267 = vrcp.f32 %v977_v16  ;;  %v2174_v16 = vpack.c.bf16 %v1611_v15, %v1610_v14 }
 0x4c3   : > { %v1142_v17 = vpop.xlane.xlu1 %1141 }
 0x4c4   : > { %2269 = vrcp.f32 %v1142_v17  ;;  %v1612_v17 = vld [vmem:[%s2820_s12 + $0x10] sm:$0xff] }
 0x4c5   : > { %v2266_v18 = vpop.eup %2265 }
 0x4c6   : > { %v814_v19 = vmul.f32 %v2266_v18, %v2258_v2  ;;  %v1613_v18 = vld [vmem:[%s2820_s12 + $0x18] sm:$0xff] }
 0x4c7   : > { %v1146_v24 = vpop.permute.xlu1 %1145 }
 0x4c8   : > { %2060 = vmatmul.mubr.msk.f32.vlgmr.msra.gmra.mrb[2].mxu1 %vm729_vm2, %v814_v19  ;;  %v2177_v19 = vpack.c.bf16 %v1613_v18, %v1612_v17 }
 0x4c9   : > { %2069 = vmatprep.mubr.msk.f32.mxu1 %vm2361_vm1, %v2362_v13  ;;  %v2268_v21 = vpop.eup %2267 }
 0x4ca   : > { %v979_v22 = vmul.f32 %v2268_v21, %v2260_v6  ;;  %v1615_v21 = vld [vmem:[%s2820_s12 + $0x28] sm:$0xff] }
 0x4cb   : > { %v1307_v20 = vpop.xlane.xlu0 %1306  ;;  %v1311_v28 = vpop.permute.xlu1 %1310 }
 0x4cc   : > { %2271 = vrcp.f32 %v1307_v20  ;;  %v1614_v20 = vld [vmem:[%s2820_s12 + $0x20] sm:$0xff] }
 0x4ce   : > { %v2270_v26 = vpop.eup %2269 }
 0x4cf   : > { %v981_v25 = vpop.permute.xlu0 %980  ;;  %v1144_v27 = vmul.f32 %v2270_v26, %v2262_v9  ;;  %v1979_v9 = vld [vmem:[%s2817_s9] ss:$0 sm:$0xff] }
 0x4d0   : > { %2068 = vmatpush3.msra.mxu1 %v981_v25  ;;  %v1617_v25 = vld [vmem:[%s2820_s12 + $0x38] sm:$0xff] }
 0x4d1   : > { %2070 = vmatmul.mubr.msk.f32.vlgmr.msra.gmra.mrb[4].mxu1 %vm729_vm2, %v979_v22  ;;  %2077 = vmatprep.subr.mxu1 %v2362_v13  ;;  %v2180_v22 = vpack.c.bf16 %v1615_v21, %v1614_v20 }
 0x4d2   : > { %2078 = vmatpush3.msra.mxu1 %v1146_v24  ;;  %2079 = vmatprep.mubr.msk.f32.mxu1 %vm2361_vm1, %v2362_v13  ;;  %v1616_v24 = vld [vmem:[%s2820_s12 + $0x30] sm:$0xff] }
 0x4d3   : > { %2087 = vmatprep.subr.mxu1 %v2362_v13  ;;  %v2183_v26 = vpack.c.bf16 %v1617_v25, %v1616_v24 }
 0x4d5   : > { %2080 = vmatmul.mubr.msk.f32.vlgmr.msra.gmra.mrb[6].mxu1 %vm729_vm2, %v1144_v27  ;;  %v1980_v27 = vld [vmem:[%s2819_s11] ss:$0 sm:$0xff] }
 0x4d6   : > { %v2272_v29 = vpop.eup %2271  ;;  %2088 = vmatpush3.msra.mxu1 %v1311_v28  ;;  %2089 = vmatprep.mubr.msk.f32.mxu1 %vm2361_vm1, %v2362_v13 }
 0x4d7   : > { %v1309_v30 = vmul.f32 %v2272_v29, %v2264_v12  ;;  %2167 = vmatprep.subr.bf16.mxu1 %v2360_v10 }
 0x4d9   : > { %2090 = vmatmul.mubr.msk.f32.vlgmr.msra.gmra.mrb[8].mxu1 %vm729_vm2, %v1309_v30 }
 0x4da   : > { %2111 = vmatprep.mubr.msk.f32.mxu1 %vm2361_vm1, %v2362_v13  ;;  %2169 = vmatpush3.bf16.msra.mxu1 %v2168_v0 }
 0x4db   : > { %2170 = vmatprep.subr.bf16.mxu1 %v2360_v10 }
 0x59b   : > { %v887_v34 = vpop.f32.mrb[2].mxu1 }
 0x59c   : > { %v2061_v35 = vpop.f32.mrb[3].mxu1 }
 0x5a4   : > { %v1052_v39 = vpop.f32.mrb[4].mxu1 }
 0x5a5   : > { %1387 = vrot.lane.b32.xlu0 %v1052_v39, %s2375_s2  ;;  %v2071_v40 = vpop.f32.mrb[5].mxu1  ;;  %s598_s2 = sand.u32 1, %s2349_s3  }
 0x5a6   : > { %v1982_v40 = vld [vmem:[%s2821_s13] ss:$0 sm:$0xff]  ;;  %s599_s1 = scalar_lea.vmem [#allocation4], %s598_s2  ;;  %s1888_s24 = scalar_lea.sflag [#allocation5], %s598_s2 }
 0x5a7   : > { %s1900_s29 = sshll.u32 %s599_s1, 4  ;;  %s2768_s29 = int_to_ptr.vmem [resolvable:$true] %s1900_s29 }
 0x5a8   : > { %v1217_v41 = vpop.f32.mrb[6].mxu1 }
 0x5a9   : > { %1391 = vrot.lane.b32.xlu1 %v1217_v41, %s2376_s28  ;;  %v2081_v42 = vpop.f32.mrb[7].mxu1  ;;  %s2293_s28 = scalar_lea.vmem %s2768_s29, 16 }
 0x5aa   : > { %p2294_p2 = scmp.ne.s32.totalorder %s2768_s29, %s2293_s28 }
 0x5ac   : > { %v1382_v43 = vpop.f32.mrb[8].mxu1  ;;  %p2295_p3 = pnand %p2294_p2, %p2525_p10 }
 0x5ad   : > { %1395 = vrot.lane.b32.xlu0 %v1382_v43, %s2377_s26  ;;  %v2091_v44 = vpop.f32.mrb[9].mxu1  ;;  %s2297_s26 = sshll.u32 %s2378_s14, 4  ;;  %s2298_s26 = int_to_ptr.vmem [resolvable:$false] %s2297_s26 }
 0x5ae   : > { %p2296_p4 = pneg %p2295_p3  ;;  %s2299_s4 = scalar_lea.vmem %s2298_s26, 32 }
 0x5af   : > { %p2300_p5 = scmp.lt.s32.totalorder %s2768_s29, %s2298_s26  ;;  %p2301_p6 = scmp.lt.s32.totalorder %s2299_s4, %s2293_s28 }
 0x5b1   : > { %p2302_p7 = por %p2301_p6, %p2300_p5 }
 0x5b3   : > { %p2303_p8 = pnand %p2302_p7, %p2296_p4 }
 0x617   : > { %v1388_v45 = vpop.permute.xlu0 %1387 }
 0x618   : > { %v1398_v47 = vsel %vm729_vm2, %v887_v34, %v1388_v45 }
 0x61b   : > { %v1392_v46 = vpop.permute.xlu1 %1391 }
 0x61c   : > { %v1400_v48 = vsel %vm1399_vm4, %v1398_v47, %v1392_v46 }
 0x61f   : > { %v1396_v49 = vpop.permute.xlu0 %1395 }
 0x620   : > { %v1402_v50 = vsel %vm1401_vm5, %v1400_v48, %v1396_v49 }
 0x621   : > { %2101 = vmatmul.mubr.msk.f32.vlgmr.msra.gmra.mrb[8].mxu0 %vm613_vm0, %v1402_v50 }
 0x622   : > { %2130 = vmatprep.mubr.msk.f32.mxu0 %vm2361_vm1, %v2362_v13  ;;  %2175 = vmatpush3.bf16.msra.mxu0 %v2174_v16 }
 0x623   : > { %2176 = vmatprep.subr.bf16.mxu0 %v2360_v10 }
 0x626   : > { %2178 = vmatpush3.bf16.msra.mxu0 %v2177_v19 }
 0x627   : > { %2179 = vmatprep.subr.bf16.mxu0 %v2360_v10 }
 0x62a   : > { %2181 = vmatpush3.bf16.msra.mxu0 %v2180_v22 }
 0x62b   : > { %2182 = vmatprep.subr.bf16.mxu0 %v2360_v10 }
 0x62e   : > { %2184 = vmatpush3.bf16.msra.mxu0 %v2183_v26 }
 0x6f4   : > { %v1483_v52 = vpop.f32.mrb[8].mxu0 }
 0x6f5   : > { %v1484_v53 = vadd.f32 %v1976_v51, %v1483_v52  ;;  %v2102_v54 = vpop.f32.mrb[9].mxu0  ;;  %v1729_v51 = vld [vmem:[%s2824_s16] sm:$0xff]  ;;  %v1730_v52 = vld [vmem:[%s2824_s16 + $0x8] sm:$0xff] }
 0x6f6   : > { %v1731_v54 = vld [vmem:[%s2824_s16 + $0x10] sm:$0xff] }
 0x6f7   : > { %v1487_v55 = vadd.f32 %v1484_v53, %v2568_v23  ;;  %v1519_v23 = vld [vmem:[%s2818_s10 + $0x10] sm:$0xff]  ;;  %v2186_v53 = vpack.c.bf16 %v1730_v52, %v1729_v51 }
 0x6f8   : > { %v2171_v2 = vpack.c.bf16 %v1520_v1, %v1519_v23  ;;  %v1808_v1 = vld [vmem:[%s2826_s18] sm:$0xff] }
 0x6f9   : > { %v1490_v56 = vsel %vm613_vm0, %v1487_v55, 0.0 }
 0x6fa   : > { %1491 = vadd.xlane.f32.xlu1 %v1490_v56  ;;  %2172 = vmatpush3.bf16.msra.mxu1 %v2171_v2  ;;  %v1809_v2 = vld [vmem:[%s2826_s18 + $0x8] sm:$0xff] }
 0x6fb   : > { %2185 = vmatprep.subr.bf16.mxu1 %v2360_v10 }
 0x787   : > { %v1492_v57 = vpop.xlane.xlu1 %1491 }
 0x788   : > { %v1493_v58 = vmul.f32 0.03125, %v1492_v57 }
 0x78a   : > { %v1494_v59 = vsub.f32 %v1487_v55, %v1493_v58  ;;  %v1732_v55 = vld [vmem:[%s2824_s16 + $0x18] sm:$0xff] }
 0x78b   : > { %v2189_v56 = vpack.c.bf16 %v1732_v55, %v1731_v54 }
 0x78c   : > { %v1495_v60 = vmul.f32 %v1494_v59, %v1494_v59 }
 0x78e   : > { %v1496_v61 = vsel %vm613_vm0, %v1495_v60, 0.0 }
 0x78f   : > { %1497 = vadd.xlane.f32.xlu0 %v1496_v61  ;;  %v1984_v61 = vld [vmem:[%s2853_s22] ss:$0 sm:$0xff] }
 0x81c   : > { %v1498_v3 = vpop.xlane.xlu0 %1497 }
 0x81d   : > { %v1499_v4 = vmul.f32 0.03125, %v1498_v3  ;;  %v1810_v3 = vld [vmem:[%s2826_s18 + $0x10] sm:$0xff] }
 0x81f   : > { %v1500_v5 = vadd.f32 1e-12, %v1499_v4  ;;  %v2192_v4 = vpack.c.bf16 %v1809_v2, %v1808_v1 }
 0x821   : > { %2273 = vrsqrt.f32 %v1500_v5  ;;  %v1811_v5 = vld [vmem:[%s2826_s18 + $0x18] sm:$0xff] }
 0x82b   : > { %v2274_v6 = vpop.eup %2273 }
 0x82c   : > { %v1502_v8 = vmul.f32 %v2274_v6, %v1494_v59  ;;  %v1733_v6 = vld [vmem:[%s2825_s17] sm:$0x1] }
 0x82e   : > { %v1509_v11 = vmul.f32 %v1978_v7, %v1502_v8 }
 0x830   : > { %v1516_v12 = vadd.f32 %v1979_v9, %v1509_v11 }
 0x832   : > { %2112 = vmatmul.mubr.msk.f32.vlgmr.msra.gmra.mrb[10].mxu1 %vm613_vm0, %v1516_v12 }
 0x833   : > { %2141 = vmatprep.mubr.msk.f32.mxu1 %vm2361_vm1, %v2362_v13  ;;  %2187 = vmatpush3.bf16.msra.mxu1 %v2186_v53 }
 0x834   : > { %2188 = vmatprep.subr.bf16.mxu1 %v2360_v10 }
 0x837   : > { %2190 = vmatpush3.bf16.msra.mxu1 %v2189_v56 }
 0x838   : > { %2191 = vmatprep.subr.bf16.mxu1 %v2360_v10 }
 0x905   : > { %v1597_v28 = vpop.f32.mrb[10].mxu1 }
 0x906   : > { %v1598_v29 = vadd.f32 %v1980_v27, %v1597_v28  ;;  %v2113_v30 = vpop.f32.mrb[11].mxu1 }
 0x908   : > { %v1602_v31 = vmul.f32 0.044715, %v1598_v29  ;;  %v1601_v37 = vmul.f32 0.5, %v1598_v29 }
 0x90a   : > { %v1603_v32 = vmul.f32 %v1602_v31, %v1598_v29 }
 0x90c   : > { %v1604_v33 = vmul.f32 %v1603_v32, %v1598_v29 }
 0x90e   : > { %v1605_v34 = vadd.f32 %v1604_v33, %v1598_v29 }
 0x910   : > { %v1606_v35 = vmul.f32 0.7978846, %v1605_v34 }
 0x912   : > { %2275 = vtanh.f32 %v1606_v35 }
 0x91c   : > { %v2276_v36 = vpop.eup %2275 }
 0x91d   : > { %v1608_v38 = vadd.f32 1.0, %v2276_v36 }
 0x91f   : > { %v1609_v39 = vmul.f32 %v1608_v38, %v1601_v37 }
 0x921   : > { %2131 = vmatmul.mubr.msk.f32.vlgmr.msra.gmra.mrb[10].mxu0 %vm1625_vm6, %v1609_v39 }
 0x9f4   : > { %v1695_v41 = vpop.f32.mrb[10].mxu0 }
 0x9f5   : > { %v1696_v42 = vadd.f32 %v1982_v40, %v1695_v41  ;;  %v2132_v43 = vpop.f32.mrb[11].mxu0 }
 0x9f7   : > { %v1699_v44 = vadd.f32 %v1696_v42, %v1516_v12  ;;  %v1812_v12 = vld [vmem:[%s2827_s19] sm:$0x1] }
 0x9f9   : > { %v1702_v45 = vsel %vm613_vm0, %v1699_v44, 0.0 }
 0x9fa   : > { %1703 = vadd.xlane.f32.xlu0 %v1702_v45 }
 0xa87   : > { %v1704_v46 = vpop.xlane.xlu0 %1703 }
 0xa88   : > { %v1705_v47 = vmul.f32 0.03125, %v1704_v46 }
 0xa8a   : > { %v1706_v48 = vsub.f32 %v1699_v44, %v1705_v47 }
 0xa8c   : > { %v1707_v49 = vmul.f32 %v1706_v48, %v1706_v48 }
 0xa8e   : > { %v1708_v50 = vsel %vm613_vm0, %v1707_v49, 0.0 }
 0xa8f   : > { %1709 = vadd.xlane.f32.xlu1 %v1708_v50 }
 0xb1c   : > { %v1710_v57 = vpop.xlane.xlu1 %1709 }
 0xb1d   : > { %v1711_v58 = vmul.f32 0.03125, %v1710_v57 }
 0xb1f   : > { %v1712_v59 = vadd.f32 1e-12, %v1711_v58 }
 0xb21   : > { %2277 = vrsqrt.f32 %v1712_v59 }
 0xb2b   : > { %v2278_v60 = vpop.eup %2277 }
 0xb2c   : > { %v1714_v62 = vmul.f32 %v2278_v60, %v1706_v48 }
 0xb2e   : > { %v1721_v0 = vmul.f32 %v1984_v61, %v1714_v62 }
 0xb30   : > { %v1728_v23 = vadd.f32 %v1985_v63, %v1721_v0 }
 0xb32   : > { %2142 = vmatmul.mubr.msk.f32.vlgmr.msra.gmra.mrb[12].mxu1 %vm613_vm0, %v1728_v23 }
 0xb33   : > { %2152 = vmatprep.mubr.msk.f32.mxu1 %vm2361_vm1, %v2362_v13  ;;  %2193 = vmatpush3.bf16.msra.mxu1 %v2192_v4  ;;  %v2195_v13 = vpack.c.bf16 %v1811_v5, %v1810_v3 }
 0xb34   : > { %2194 = vmatprep.subr.bf16.mxu1 %v2360_v10 }
 0xb37   : > { %2196 = vmatpush3.bf16.msra.mxu1 %v2195_v13 }
 0xc05   : > { %v1803_v7 = vpop.f32.mrb[12].mxu1 }
 0xc06   : > { %v1804_v8 = vadd.f32 %v1803_v7, %v1733_v6  ;;  %v2143_v9 = vpop.f32.mrb[13].mxu1 }
 0xc08   : > { %2279 = vtanh.f32 %v1804_v8 }
 0xc12   : > { %v2280_v11 = vpop.eup %2279 }
 0xc13   : > { %2153 = vmatmul.mubr.msk.f32.vlgmr.msra.gmra.mrb[14].mxu1 %vm613_vm0, %v2280_v11 }
 0xce6   : > { %v1882_v10 = vpop.f32.mrb[14].mxu1 }
 0xce7   : > { %v1883_v14 = vadd.f32 %v1882_v10, %v1812_v12  ;;  %v2154_v15 = vpop.f32.mrb[15].mxu1 }
 0xce9   : > { %1886 = vst [vmem:[%s599_s1] sm:$0x1] %v1883_v14 }
 0xcea   : > { %2306 = shalt.err (!%p2303_p8)
}
 0xceb   : > { %s2307_s2 = scalar_lea.hbm %s2766_s23, 16  ;;  %s2311_s30 = scalar_lea.hbm %s2828_s20, 32 }
 0xcec   : > { %p2308_p9 = scmp.ne.s32.totalorder %s2766_s23, %s2307_s2  ;;  %p2312_p0 = scmp.lt.u32.totalorder %s2766_s23, %s2828_s20 }
 0xced   : > { %p2313_p1 = scmp.lt.u32.totalorder %s2311_s30, %s2307_s2  ;;  %p2315_p3 = scmp.lt.u32.totalorder %s2307_s2, %s2766_s23 }
 0xcee   : > { %p2309_p12 = pnand %p2308_p9, %p2525_p10 }
 0xcef   : > { %p2314_p2 = por %p2313_p1, %p2312_p0 }
 0xcf0   : > { %p2310_p13 = pneg %p2309_p12 }
 0xcf1   : > { %p2316_p4 = por %p2315_p3, %p2314_p2 }
 0xcf3   : > { %p2317_p5 = pnand %p2316_p4, %p2310_p13 }
 0xcf5   : > { %2320 = shalt.err (!%p2317_p5)
}
 0xcf6   : > { %2197 = dma.vmem_to_hbm [thread:$0]  (%p2525_p10), %s2768_s29, 16, %s2766_s23, %s1888_s24  }
 0xcf7 PF: > { %p2203_p6 = scmp.ge.s32.totalorder %s2357_s27, 2  ;;  %s1912_s28 = sand.u32 1, %s2345_s25  }
 0xcf8   : > { %s1913_s26 = scalar_lea.sflag [#allocation5], %s1912_s28 }
 0xcf9   : > { %p2200_p7 = pnand %p2203_p6, %p2529_p11 }
 0xcfb   : > { %2340 = dma.done.wait (!%p2200_p7), %s1913_s26, 16  }
 0xcfc   : > { %2342 = vsyncadd (!%p2200_p7), %s1913_s26, 4294967280  ;;  %s2855_s27 = sld [smem:[#allocation9_spill]]  ;;  %s2856_s2 = sld [smem:[#allocation8_spill]] }
 0xcfd   : > { %s2857_s26 = sld [smem:[#allocation10_spill]]  ;;  %s2858_s25 = smov %s2349_s3 }
 0xd02   : > { %p36_p8 = scmp.ge.s32.totalorder %s2855_s27, 4   ;;  %s2859_s3 = smov %s2856_s2 }
 0xd04   :  { %38 = sbr.rel (!%p36_p8) target bundleno = 25 (0x19), region = 131 }
 0xd0b   :  { %1917 = vsyncpa [#allocation5], 1 }
 0xd0c   :  { %1919 = vsyncpa [#allocation5 + $0x1], 1 }

</bundles_post_ra>
